<compile_context>
chip_gen: v6e
topology: v6e:2x2x1
jax: 0.10.0
libtpu: 0.0.40
codegen_flags: <defaults>
</compile_context>

<pallas_src>
import math
import jax
import jax.numpy as jnp
from jax.experimental import pallas as pl
from jax.experimental.pallas import tpu as pltpu


# --------------------------------------------------------------------------
# Single cell step: both matmuls fused in one kernel, f32 accumulation.
# --------------------------------------------------------------------------
def lstm_relu_cell_kernel(x_ref, h_ref, c_ref, w_ih_ref, w_hh_ref, b_ref,
                          h_out_ref, c_out_ref):
    wdt = w_ih_ref.dtype
    pre = (jnp.dot(x_ref[...].astype(wdt), w_ih_ref[...],
                   preferred_element_type=jnp.float32)
           + jnp.dot(h_ref[...].astype(wdt), w_hh_ref[...],
                     preferred_element_type=jnp.float32)
           + b_ref[...])

    H = c_ref.shape[-1]
    # One EUP pass over the whole [B, 4H] tile, then slice the sigmoid gates.
    sig_all = jax.nn.sigmoid(pre)
    i_g = sig_all[:, 0 * H:1 * H]
    f_g = sig_all[:, 1 * H:2 * H]
    o_g = sig_all[:, 3 * H:4 * H]
    g_g = jnp.maximum(pre[:, 2 * H:3 * H], 0.0)

    c_new = f_g * c_ref[...] + i_g * g_g
    h_new = o_g * jnp.maximum(c_new, 0.0)

    h_out_ref[...] = h_new.astype(h_out_ref.dtype)
    c_out_ref[...] = c_new.astype(c_out_ref.dtype)


def rnn_base_forward(x, h, c, w_ih_T, w_hh_T, b2d):
    """Single cell step (matches RNNBase.forward).

    x:[B,I], h/c:[B,H] (f32); w_ih_T:[I,4H], w_hh_T:[H,4H] pre-transposed once
    at init (dtype f32 or bf16); b2d:[1,4H] f32.  Returns (h', c') in f32.
    """
    B, I = x.shape
    H = h.shape[-1]
    G = 4 * H

    full = lambda shape: pl.BlockSpec(shape, lambda i: (0,) * len(shape))

    h_new, c_new = pl.pallas_call(
        lstm_relu_cell_kernel,
        grid=(1,),
        in_specs=[
            full((B, I)),        # x
            full((B, H)),        # h
            full((B, H)),        # c
            full((I, G)),        # w_ih.T
            full((H, G)),        # w_hh.T
            full((1, G)),        # b_ih
        ],
        out_specs=[full((B, H)), full((B, H))],
        out_shape=(jax.ShapeDtypeStruct((B, H), jnp.float32),
                   jax.ShapeDtypeStruct((B, H), jnp.float32)),
        compiler_params=pltpu.CompilerParams(
            dimension_semantics=("arbitrary",)),
    )(x, h, c, w_ih_T, w_hh_T, b2d)
    return h_new, c_new


# --------------------------------------------------------------------------
# T-step recurrence inside ONE pallas_call (repeated application of the same
# cell).  w_hh stays resident in VMEM (constant index_map), h/c are carried in
# the resident output refs, and the non-recurrent x-projection is hoisted out
# of the loop as one large matmul.
# --------------------------------------------------------------------------
def lstm_relu_seq_kernel(pre_x_ref, h0_ref, c0_ref, w_hh_ref,
                         h_out_ref, c_out_ref):
    t = pl.program_id(0)

    @pl.when(t == 0)
    def _():
        h_out_ref[...] = h0_ref[...].astype(h_out_ref.dtype)
        c_out_ref[...] = c0_ref[...].astype(c_out_ref.dtype)

    H = h_out_ref.shape[-1]
    h = h_out_ref[...]
    c = c_out_ref[...]

    # Only the recurrent matmul sits on the serial critical path.
    pre = pre_x_ref[0] + jnp.dot(h.astype(w_hh_ref.dtype), w_hh_ref[...],
                                 preferred_element_type=jnp.float32)

    sig_all = jax.nn.sigmoid(pre)
    i_g = sig_all[:, 0 * H:1 * H]
    f_g = sig_all[:, 1 * H:2 * H]
    o_g = sig_all[:, 3 * H:4 * H]
    g_g = jnp.maximum(pre[:, 2 * H:3 * H], 0.0)

    c_new = f_g * c + i_g * g_g
    h_new = o_g * jnp.maximum(c_new, 0.0)

    c_out_ref[...] = c_new.astype(c_out_ref.dtype)
    h_out_ref[...] = h_new.astype(h_out_ref.dtype)


def rnn_base_forward_seq(x_seq, h0, c0, w_ih_T, w_hh_T, b2d):
    """Apply the cell over x_seq:[T,B,I]; returns final (h, c)."""
    T, B, I = x_seq.shape
    H = h0.shape[-1]
    G = 4 * H

    # Hoist the non-recurrent input projection: one [T*B, I] x [I, 4H] matmul
    # (f32 accumulate) instead of T tiny ones inside the recurrence.
    x2 = x_seq.reshape(T * B, I).astype(w_ih_T.dtype)
    pre_x = (jnp.dot(x2, w_ih_T, preferred_element_type=jnp.float32)
             + b2d).reshape(T, B, G)

    h_f, c_f = pl.pallas_call(
        lstm_relu_seq_kernel,
        grid=(T,),
        in_specs=[
            pl.BlockSpec((1, B, G), lambda t: (t, 0, 0)),   # per-step x proj
            pl.BlockSpec((B, H), lambda t: (0, 0)),          # h0 (loaded once)
            pl.BlockSpec((B, H), lambda t: (0, 0)),          # c0 (loaded once)
            pl.BlockSpec((H, G), lambda t: (0, 0)),          # w_hh resident
        ],
        out_specs=[
            pl.BlockSpec((B, H), lambda t: (0, 0)),          # h carried/resident
            pl.BlockSpec((B, H), lambda t: (0, 0)),          # c carried/resident
        ],
        out_shape=(
            jax.ShapeDtypeStruct((B, H), jnp.float32),
            jax.ShapeDtypeStruct((B, H), jnp.float32),
        ),
        compiler_params=pltpu.CompilerParams(
            dimension_semantics=("arbitrary",)),
    )(pre_x, h0, c0, w_hh_T)
    return h_f, c_f


# --------------------------------------------------------------------------
# Pure-JAX reference (mirrors the PyTorch forward exactly).
# --------------------------------------------------------------------------
def rnn_base_forward_ref(x, h, c, w_ih, w_hh, b_ih):
    H = h.shape[-1]
    pre = x @ w_ih.T + b_ih + h @ w_hh.T
    i_g = jax.nn.sigmoid(pre[:, :H])
    f_g = jax.nn.sigmoid(pre[:, H:2 * H])
    g_g = jnp.maximum(pre[:, 2 * H:3 * H], 0.0)
    o_g = jax.nn.sigmoid(pre[:, 3 * H:])
    c_new = f_g * c + i_g * g_g
    h_new = o_g * jnp.maximum(c_new, 0.0)
    return h_new, c_new


if __name__ == "__main__":
    # Module config: mode='LSTM', input_size=16, hidden_size=32, num_layers=1
    B, INPUT, HIDDEN, T = 8, 16, 32, 16
    GATE = 4 * HIDDEN

    key = jax.random.PRNGKey(0)
    kx, kxs, kh, kc, k1, k2, k3, k4 = jax.random.split(key, 8)

    # reset_parameters(): uniform(-stdv, stdv), stdv = 1/sqrt(hidden_size)
    stdv = 1.0 / math.sqrt(HIDDEN)
    w_ih = jax.random.uniform(k1, (GATE, INPUT), jnp.float32, -stdv, stdv)
    w_hh = jax.random.uniform(k2, (GATE, HIDDEN), jnp.float32, -stdv, stdv)
    b_ih = jax.random.uniform(k3, (GATE,), jnp.float32, -stdv, stdv)
    b_hh = jax.random.uniform(k4, (GATE,), jnp.float32, -stdv, stdv)  # unused by forward

    # One-time parameter prep (hoisted out of the forward path):
    w_ih_T = jnp.transpose(w_ih)      # [I, 4H]
    w_hh_T = jnp.transpose(w_hh)      # [H, 4H]
    b2d = b_ih.reshape(1, GATE)       # [1, 4H]

    x = jax.random.normal(kx, (B, INPUT), jnp.float32)
    h0 = jax.random.normal(kh, (B, HIDDEN), jnp.float32)
    c0 = jax.random.normal(kc, (B, HIDDEN), jnp.float32)

    # ---- single step, f32 matmul operands ----
    h1, c1 = rnn_base_forward(x, h0, c0, w_ih_T, w_hh_T, b2d)
    jax.block_until_ready((h1, c1))
    h_r, c_r = rnn_base_forward_ref(x, h0, c0, w_ih, w_hh, b_ih)
    assert jnp.allclose(h1, h_r, atol=1e-5, rtol=1e-5)
    assert jnp.allclose(c1, c_r, atol=1e-5, rtol=1e-5)

    # ---- single step, bf16 matmul operands (v6e/v7x MXU path, f32 gate math) ----
    h1b, c1b = rnn_base_forward(x, h0, c0,
                                w_ih_T.astype(jnp.bfloat16),
                                w_hh_T.astype(jnp.bfloat16), b2d)
    jax.block_until_ready((h1b, c1b))
    assert jnp.allclose(h1b, h_r, atol=2e-2, rtol=2e-2)
    assert jnp.allclose(c1b, c_r, atol=2e-2, rtol=2e-2)

    # ---- T-step recurrence inside one pallas_call (weights/state VMEM-resident) ----
    x_seq = jax.random.normal(kxs, (T, B, INPUT), jnp.float32)
    hT, cT = rnn_base_forward_seq(x_seq, h0, c0, w_ih_T, w_hh_T, b2d)
    jax.block_until_ready((hT, cT))
    h_acc, c_acc = h0, c0
    for t in range(T):
        h_acc, c_acc = rnn_base_forward_ref(x_seq[t], h_acc, c_acc,
                                            w_ih, w_hh, b_ih)
    assert jnp.allclose(hT, h_acc, atol=1e-3, rtol=1e-3)
    assert jnp.allclose(cT, c_acc, atol=1e-3, rtol=1e-3)

    print("KERNEL_OK")
</pallas_src>

<mosaic_0001>
module attributes {stable_mosaic.version = 11 : i64} {
  func.func @lstm_relu_cell_kernel(%arg0: i32, %arg1: memref<8x16xf32, #tpu.memory_space<vmem>>, %arg2: memref<8x32xf32, #tpu.memory_space<vmem>>, %arg3: memref<8x32xf32, #tpu.memory_space<vmem>>, %arg4: memref<16x128xf32, #tpu.memory_space<vmem>>, %arg5: memref<32x128xf32, #tpu.memory_space<vmem>>, %arg6: memref<1x128xf32, #tpu.memory_space<vmem>>, %arg7: memref<8x32xf32, #tpu.memory_space<vmem>>, %arg8: memref<8x32xf32, #tpu.memory_space<vmem>>) attributes {dimension_semantics = [#tpu.dimension_semantics<arbitrary>], iteration_bounds = array<i64: 1>, scalar_prefetch = 0 : i64, scratch_operands = 0 : i64, tpu.core_type = #tpu.core_type<tc>, window_params = [{pipeline_mode = #tpu.pipeline_mode<synchronous>, transform_indices = @transform_0, window_bounds = array<i64: 8, 16>}, {pipeline_mode = #tpu.pipeline_mode<synchronous>, transform_indices = @transform_1, window_bounds = array<i64: 8, 32>}, {pipeline_mode = #tpu.pipeline_mode<synchronous>, transform_indices = @transform_2, window_bounds = array<i64: 8, 32>}, {pipeline_mode = #tpu.pipeline_mode<synchronous>, transform_indices = @transform_3, window_bounds = array<i64: 16, 128>}, {pipeline_mode = #tpu.pipeline_mode<synchronous>, transform_indices = @transform_4, window_bounds = array<i64: 32, 128>}, {pipeline_mode = #tpu.pipeline_mode<synchronous>, transform_indices = @transform_5, window_bounds = array<i64: 1, 128>}, {pipeline_mode = #tpu.pipeline_mode<synchronous>, transform_indices = @transform_6, window_bounds = array<i64: 8, 32>}, {pipeline_mode = #tpu.pipeline_mode<synchronous>, transform_indices = @transform_7, window_bounds = array<i64: 8, 32>}]} {
    %c0 = arith.constant 0 : index
    %c0_0 = arith.constant 0 : index
    %0 = vector.load %arg1[%c0, %c0_0] : memref<8x16xf32, #tpu.memory_space<vmem>>, vector<8x16xf32>
    %c0_1 = arith.constant 0 : index
    %c0_2 = arith.constant 0 : index
    %1 = vector.load %arg4[%c0_1, %c0_2] : memref<16x128xf32, #tpu.memory_space<vmem>>, vector<16x128xf32>
    %cst = arith.constant dense<0.000000e+00> : vector<8x128xf32>
    %2 = tpu.matmul %0, %1, %cst {dimension_numbers = #tpu.dot_dimension_numbers<[1], [0], [0], [1], [0, 0, 1, 1], [], []>} : vector<8x16xf32>, vector<16x128xf32>, vector<8x128xf32> -> vector<8x128xf32>
    %c0_3 = arith.constant 0 : index
    %c0_4 = arith.constant 0 : index
    %3 = vector.load %arg2[%c0_3, %c0_4] : memref<8x32xf32, #tpu.memory_space<vmem>>, vector<8x32xf32>
    %c0_5 = arith.constant 0 : index
    %c0_6 = arith.constant 0 : index
    %4 = vector.load %arg5[%c0_5, %c0_6] : memref<32x128xf32, #tpu.memory_space<vmem>>, vector<32x128xf32>
    %cst_7 = arith.constant dense<0.000000e+00> : vector<8x128xf32>
    %5 = tpu.matmul %3, %4, %cst_7 {dimension_numbers = #tpu.dot_dimension_numbers<[1], [0], [0], [1], [0, 0, 1, 1], [], []>} : vector<8x32xf32>, vector<32x128xf32>, vector<8x128xf32> -> vector<8x128xf32>
    %6 = arith.addf %2, %5 : vector<8x128xf32>
    %c0_8 = arith.constant 0 : index
    %c0_9 = arith.constant 0 : index
    %7 = vector.load %arg6[%c0_8, %c0_9] : memref<1x128xf32, #tpu.memory_space<vmem>>, vector<1x128xf32>
    %8 = vector.broadcast %7 : vector<1x128xf32> to vector<8x128xf32>
    %9 = arith.addf %6, %8 : vector<8x128xf32>
    %10 = arith.negf %9 : vector<8x128xf32>
    %11 = math.exp %10 : vector<8x128xf32>
    %cst_10 = arith.constant 1.000000e+00 : f32
    %12 = vector.broadcast %cst_10 : f32 to vector<8x128xf32>
    %13 = arith.addf %12, %11 : vector<8x128xf32>
    %14 = arith.divf %12, %13 : vector<8x128xf32>
    %15 = vector.extract_strided_slice %14 {offsets = [0, 0], sizes = [8, 32], strides = [1, 1]} : vector<8x128xf32> to vector<8x32xf32>
    %16 = vector.extract_strided_slice %14 {offsets = [0, 32], sizes = [8, 32], strides = [1, 1]} : vector<8x128xf32> to vector<8x32xf32>
    %17 = vector.extract_strided_slice %14 {offsets = [0, 96], sizes = [8, 32], strides = [1, 1]} : vector<8x128xf32> to vector<8x32xf32>
    %18 = vector.extract_strided_slice %9 {offsets = [0, 64], sizes = [8, 32], strides = [1, 1]} : vector<8x128xf32> to vector<8x32xf32>
    %cst_11 = arith.constant 0.000000e+00 : f32
    %19 = vector.broadcast %cst_11 : f32 to vector<8x32xf32>
    %20 = arith.maximumf %18, %19 : vector<8x32xf32>
    %c0_12 = arith.constant 0 : index
    %c0_13 = arith.constant 0 : index
    %21 = vector.load %arg3[%c0_12, %c0_13] : memref<8x32xf32, #tpu.memory_space<vmem>>, vector<8x32xf32>
    %22 = arith.mulf %16, %21 : vector<8x32xf32>
    %23 = arith.mulf %15, %20 : vector<8x32xf32>
    %24 = arith.addf %22, %23 : vector<8x32xf32>
    %cst_14 = arith.constant 0.000000e+00 : f32
    %25 = vector.broadcast %cst_14 : f32 to vector<8x32xf32>
    %26 = arith.maximumf %24, %25 : vector<8x32xf32>
    %27 = arith.mulf %17, %26 : vector<8x32xf32>
    %c0_15 = arith.constant 0 : index
    %c0_16 = arith.constant 0 : index
    %28 = vector.load %arg7[%c0_15, %c0_16] : memref<8x32xf32, #tpu.memory_space<vmem>>, vector<8x32xf32>
    tpu.vector_store %arg7[%c0_15, %c0_16], %27 {strides = array<i32>} : memref<8x32xf32, #tpu.memory_space<vmem>>, vector<8x32xf32>,
    %c0_17 = arith.constant 0 : index
    %c0_18 = arith.constant 0 : index
    %29 = vector.load %arg8[%c0_17, %c0_18] : memref<8x32xf32, #tpu.memory_space<vmem>>, vector<8x32xf32>
    tpu.vector_store %arg8[%c0_17, %c0_18], %24 {strides = array<i32>} : memref<8x32xf32, #tpu.memory_space<vmem>>, vector<8x32xf32>,
    return
  }
  func.func @transform_0(%arg0: i32) -> (i32, i32) {
    %c0_i32 = arith.constant 0 : i32
    %c0_i32_0 = arith.constant 0 : i32
    %c0_i32_1 = arith.constant 0 : i32
    return %c0_i32, %c0_i32_0 : i32, i32
  }
  func.func @transform_1(%arg0: i32) -> (i32, i32) {
    %c0_i32 = arith.constant 0 : i32
    %c0_i32_0 = arith.constant 0 : i32
    %c0_i32_1 = arith.constant 0 : i32
    return %c0_i32, %c0_i32_0 : i32, i32
  }
  func.func @transform_2(%arg0: i32) -> (i32, i32) {
    %c0_i32 = arith.constant 0 : i32
    %c0_i32_0 = arith.constant 0 : i32
    %c0_i32_1 = arith.constant 0 : i32
    return %c0_i32, %c0_i32_0 : i32, i32
  }
  func.func @transform_3(%arg0: i32) -> (i32, i32) {
    %c0_i32 = arith.constant 0 : i32
    %c0_i32_0 = arith.constant 0 : i32
    %c0_i32_1 = arith.constant 0 : i32
    return %c0_i32, %c0_i32_0 : i32, i32
  }
  func.func @transform_4(%arg0: i32) -> (i32, i32) {
    %c0_i32 = arith.constant 0 : i32
    %c0_i32_0 = arith.constant 0 : i32
    %c0_i32_1 = arith.constant 0 : i32
    return %c0_i32, %c0_i32_0 : i32, i32
  }
  func.func @transform_5(%arg0: i32) -> (i32, i32) {
    %c0_i32 = arith.constant 0 : i32
    %c0_i32_0 = arith.constant 0 : i32
    %c0_i32_1 = arith.constant 0 : i32
    return %c0_i32, %c0_i32_0 : i32, i32
  }
  func.func @transform_6(%arg0: i32) -> (i32, i32) {
    %c0_i32 = arith.constant 0 : i32
    %c0_i32_0 = arith.constant 0 : i32
    %c0_i32_1 = arith.constant 0 : i32
    return %c0_i32, %c0_i32_0 : i32, i32
  }
  func.func @transform_7(%arg0: i32) -> (i32, i32) {
    %c0_i32 = arith.constant 0 : i32
    %c0_i32_0 = arith.constant 0 : i32
    %c0_i32_1 = arith.constant 0 : i32
    return %c0_i32, %c0_i32_0 : i32, i32
  }
}

</mosaic_0001>

<bundles_post_ra>
// kernel: tpu_custom_call.1
= control target key start
LH: loop header
LB: loop body
LE: loop exit
PB: predicated region body
PF: predicated region fallthrough
CT: control target
= control target key end

     0   :  { %13 = vsyncpa [#allocation3], 0  ;;  %s608_s0 = inlined_call_operand.hbm [shape: f32[8,16], index: 0, kind: input, shape index: {}]   ;;  %s609_s1 = inlined_call_operand.hbm [shape: f32[8,32], index: 1, kind: input, shape index: {}]   ;;  %s610_s2 = inlined_call_operand.hbm [shape: f32[8,32], index: 2, kind: input, shape index: {}]   ;;  %s611_s3 = inlined_call_operand.hbm [shape: f32[16,128], index: 3, kind: input, shape index: {}]   ;;  %s612_s4 = inlined_call_operand.hbm [shape: f32[32,128], index: 4, kind: input, shape index: {}]   ;;  %s613_s5 = inlined_call_operand.vmem [shape: f32[1,128], index: 5, kind: input, shape index: {}]   ;;  %s614_s6 = inlined_call_operand.hbm [shape: f32[8,32], index: 6, kind: output, shape index: {0}]   ;;  %s615_s7 = inlined_call_operand.hbm [shape: f32[8,32], index: 7, kind: output, shape index: {1}]  }
   0x1   :  { %14 = vsyncpa [#allocation6], 0 }
   0x2   :  { %15 = vsyncpa [#allocation9], 0 }
   0x3   :  { %16 = vsyncpa [#allocation4], 0 }
   0x4   :  { %17 = vsyncpa [#allocation13], 0  ;;  %s521_s24 = smov [#allocation5]   ;;  %s522_s26 = smov [#allocation8]  }
   0x5   :  { %s34_s25 = sshll.u32 %s521_s24, 4  ;;  %s53_s27 = sshll.u32 %s522_s26, 4  ;;  %s35_s25 = int_to_ptr.vmem [resolvable:$true] %s34_s25  ;;  %s54_s27 = int_to_ptr.vmem [resolvable:$true] %s53_s27 }
   0x6   :  { %s379_s28 = scalar_lea.vmem %s35_s25, 128  ;;  %p384_p1 = scmp.lt.s32.totalorder %s35_s25, %s35_s25 }
   0x7   :  { %p380_p0 = scmp.ne.s32.totalorder %s35_s25, %s379_s28  ;;  %p385_p2 = scmp.lt.s32.totalorder %s379_s28, %s379_s28 }
   0x9   :  { %p386_p3 = por %p385_p2, %p384_p1 }
   0xb   :  { %p387_p4 = pnand %p386_p3, %p380_p0 }
   0xd   :  { %390 = shalt.err (!%p387_p4)
}
   0xe   :  { %37 = dma.hbm_to_vmem [thread:$0]  %s609_s1, 128, %s35_s25, [#allocation6]  }
   0xf   :  { %s399_s8 = scalar_lea.vmem %s54_s27, 256  ;;  %p404_p6 = scmp.lt.s32.totalorder %s54_s27, %s54_s27 }
  0x10   :  { %p400_p5 = scmp.ne.s32.totalorder %s54_s27, %s399_s8  ;;  %p405_p7 = scmp.lt.s32.totalorder %s399_s8, %s399_s8 }
  0x12   :  { %p406_p8 = por %p405_p7, %p404_p6 }
  0x14   :  { %p407_p9 = pnand %p406_p8, %p400_p5 }
  0x16   :  { %410 = shalt.err (!%p407_p9)
}
  0x17   :  { %s523_s9 = smov 128   ;;  %s524_s10 = smov 8  }
  0x18   :  { %59 = dma.hbm_to_vmem [thread:$0]  %s611_s3, 256, %s54_s27, [#allocation9], %s523_s9, %s523_s9, %s524_s10  }
  0x19   :  { %s525_s13 = smov [#allocation2]   ;;  %s526_s15 = smov [#allocation7]  }
  0x1a   :  { %s24_s14 = sshll.u32 %s525_s13, 4  ;;  %s44_s1 = sshll.u32 %s526_s15, 4  ;;  %s25_s14 = int_to_ptr.vmem [resolvable:$true] %s24_s14  ;;  %s45_s1 = int_to_ptr.vmem [resolvable:$true] %s44_s1 }
  0x1b   :  { %s419_s16 = scalar_lea.vmem %s25_s14, 128  ;;  %p424_p11 = scmp.lt.s32.totalorder %s25_s14, %s25_s14 }
  0x1c   :  { %p420_p10 = scmp.ne.s32.totalorder %s25_s14, %s419_s16  ;;  %p425_p12 = scmp.lt.s32.totalorder %s419_s16, %s419_s16 }
  0x1e   :  { %p426_p13 = por %p425_p12, %p424_p11 }
  0x20   :  { %p427_p0 = pnand %p426_p13, %p420_p10 }
  0x22   :  { %430 = shalt.err (!%p427_p0)
}
  0x23   :  { %27 = dma.hbm_to_vmem [thread:$0]  %s608_s0, 128, %s25_s14, [#allocation3]  }
  0x24   :  { %s439_s19 = scalar_lea.vmem %s45_s1, 128  ;;  %p444_p2 = scmp.lt.s32.totalorder %s45_s1, %s45_s1 }
  0x25   :  { %p440_p1 = scmp.ne.s32.totalorder %s45_s1, %s439_s19  ;;  %p445_p3 = scmp.lt.s32.totalorder %s439_s19, %s439_s19 }
  0x27   :  { %p446_p4 = por %p445_p3, %p444_p2 }
  0x29   :  { %p447_p5 = pnand %p446_p4, %p440_p1 }
  0x2b   :  { %450 = shalt.err (!%p447_p5)
}
  0x2c   :  { %47 = dma.hbm_to_vmem [thread:$0]  %s610_s2, 128, %s45_s1, [#allocation6]  }
  0x2d   :  { %s527_s21 = smov [#allocation10]  }
  0x2e   :  { %s65_s22 = sshll.u32 %s527_s21, 4  ;;  %s66_s22 = int_to_ptr.vmem [resolvable:$true] %s65_s22 }
  0x2f   :  { %s459_s23 = scalar_lea.vmem %s66_s22, 512  ;;  %p464_p7 = scmp.lt.s32.totalorder %s66_s22, %s66_s22 }
  0x30   :  { %p460_p6 = scmp.ne.s32.totalorder %s66_s22, %s459_s23  ;;  %p465_p8 = scmp.lt.s32.totalorder %s459_s23, %s459_s23 }
  0x32   :  { %p466_p9 = por %p465_p8, %p464_p7 }
  0x34   :  { %p467_p10 = pnand %p466_p9, %p460_p6 }
  0x36   :  { %470 = shalt.err (!%p467_p10)
}
  0x37   :  { %71 = dma.hbm_to_vmem [thread:$0]  %s612_s4, 512, %s66_s22, [#allocation9], %s523_s9, %s523_s9, %s524_s10  }
  0x38   :  { %511 = dma.done.wait [#allocation3], 128  }
  0x39   :  { %512 = vsyncadd [#allocation3], 4294967168 }
  0x3a   :  { %513 = dma.done.wait [#allocation6], 256  }
  0x3b   :  { %514 = vsyncadd [#allocation6], 4294967040 }
  0x3c   :  { %515 = dma.done.wait [#allocation9], 768  }
  0x3d   :  { %516 = vsyncadd [#allocation9], 4294966528  ;;  %v528_v0 = vmov 0.0   ;;  %vm529_vm0 = vmmov 0   ;;  %v96_v1 = vld [vmem:[#allocation10 + $0x18] sm:$0xff]  ;;  %v95_v2 = vld [vmem:[#allocation10 + $0x10] sm:$0xff] }
  0x3e   :  { %335 = vmatprep.subr.mxu0 %v528_v0  ;;  %346 = vmatprep.subr.mxu1 %v528_v0  ;;  %v91_v3 = vld [vmem:[#allocation8 + $0x8] sm:$0xff]  ;;  %v90_v4 = vld [vmem:[#allocation8] sm:$0xff]  ;;  %vm171_vm1 = vcmask 130048   ;;  %v94_v6 = vld [vmem:[#allocation10 + $0x8] sm:$0xff]  ;;  %vm97_vm2 = vcmask 261120   ;;  %s530_s25 = smov 64  }
  0x3f   :  { %350 = vmatprep.mubr.msk.f32.mxu1 %vm529_vm0, %v528_v0  ;;  %343 = vmatprep.mubr.msk.f32.mxu0 %vm529_vm0, %v528_v0  ;;  %v89_v5 = vld [vmem:[#allocation2] sm:$0xff]  ;;  %v93_v7 = vld [vmem:[#allocation10] sm:$0xff]  ;;  %v260_v17 = vld [vmem:[#allocation7] sm:$0xff]  ;;  %s531_s26 = smov 32   ;;  %s533_s27 = smov [#allocation12]  }
  0x40   :  { %336 = vmatpush3.msra.mxu0 %v96_v1  ;;  %347 = vmatpush3.msra.mxu1 %v91_v3  ;;  %v92_v8 = vld [vmem:[#allocation5] sm:$0xff]  ;;  %v325_v12 = vld [vmem:[%s613_s5] ss:$0 sm:$0xff]  ;;  %s532_s5 = smov 96   ;;  %s308_s28 = sshll.u32 %s533_s27, 4  ;;  %s309_s28 = int_to_ptr.vmem [resolvable:$true] %s308_s28 }
  0x41   :  { %337 = vmatprep.subr.mxu0 %v528_v0  ;;  %348 = vmatprep.subr.mxu1 %v528_v0  ;;  %s471_s29 = scalar_lea.vmem %s309_s28, 128  ;;  %p476_p12 = scmp.lt.s32.totalorder %s309_s28, %s309_s28 }
  0x42   :  { %338 = vmatpush3.msra.mxu0 %v95_v2  ;;  %349 = vmatpush3.msra.mxu1 %v90_v4  ;;  %p472_p11 = scmp.ne.s32.totalorder %s309_s28, %s471_s29  ;;  %p477_p13 = scmp.lt.s32.totalorder %s471_s29, %s471_s29 }
  0x43   :  { %339 = vmatprep.subr.mxu0 %v528_v0  ;;  %351 = vmatmul.mubr.msk.f32.vlgmr.msra.gmra.mxu1 %vm171_vm1, %v89_v5 }
  0x44   :  { %340 = vmatpush3.msra.mxu0 %v94_v6  ;;  %p478_p0 = por %p477_p13, %p476_p12 }
  0x45   :  { %341 = vmatprep.subr.mxu0 %v528_v0 }
  0x46   :  { %342 = vmatpush3.msra.mxu0 %v93_v7  ;;  %p479_p1 = pnand %p478_p0, %p472_p11 }
  0x47   :  { %344 = vmatmul.mubr.msk.f32.vlgmr.msra.gmra.mxu0 %vm97_vm2, %v92_v8 }
 0x103   :  { %v241_v9 = vpop.f32.mrf.mxu1 }
 0x105   :  { %v352_v10 = vpop.f32.mrf.mxu1 }
 0x107   :  { %v167_v11 = vpop.f32.mrf.mxu0 }
 0x108   :  { %v242_v13 = vadd.f32 %v241_v9, %v167_v11 }
 0x109   :  { %v345_v14 = vpop.f32.mrf.mxu0 }
 0x10a   :  { %v252_v15 = vadd.f32 %v325_v12, %v242_v13 }
 0x10c   :  { %v259_v16 = vmax.f32 %v252_v15, 0.0  ;;  %v326_v18 = vmul.f32 -1.442695, %v252_v15 }
 0x10e   :  { %267 = vrot.lane.b32.xlu0 %v259_v16, %s530_s25  ;;  %367 = vpow2.f32 %v326_v18 }
 0x112   :  { %262 = vrot.lane.b32.xlu0 %v260_v17, %s531_s26 }
 0x11b   :  { %v368_v19 = vpop.eup %367 }
 0x11c   :  { %v256_v20 = vadd.f32 1.0, %v368_v19 }
 0x11e   :  { %369 = vrcp.f32 %v256_v20 }
 0x12b   :  { %v370_v21 = vpop.eup %369 }
 0x180   :  { %v268_v22 = vpop.permute.xlu0 %267 }
 0x181   :  { %v270_v23 = vmul.f32 %v370_v21, %v268_v22 }
 0x183   :  { %272 = vrot.lane.b32.xlu1 %v270_v23, %s531_s26 }
 0x184   :  { %v263_v24 = vpop.permute.xlu0 %262 }
 0x185   :  { %v265_v25 = vmul.f32 %v370_v21, %v263_v24 }
 0x1f5   :  { %v273_v26 = vpop.permute.xlu1 %272 }
 0x1f6   :  { %v275_v27 = vadd.f32 %v273_v26, %v265_v25 }
 0x1f8   :  { %v276_v28 = vmax.f32 %v275_v27, 0.0 }
 0x1fa   :  { %278 = vrot.lane.b32.xlu1 %v276_v28, %s530_s25 }
 0x1fe   :  { %288 = vrot.lane.b32.xlu1 %v275_v27, %s532_s5 }
 0x26c   :  { %v279_v29 = vpop.permute.xlu1 %278 }
 0x26d   :  { %v281_v30 = vmul.f32 %v370_v21, %v279_v29 }
 0x26f   :  { %283 = vrot.lane.b32.xlu0 %v281_v30, %s531_s26 }
 0x270   :  { %v289_v31 = vpop.permute.xlu1 %288 }
 0x271   :  { %291 = vst.msk [vmem:[#allocation12] sm:$0xff] %vm97_vm2, %v289_v31 }
 0x272   :  { %482 = shalt.err (!%p479_p1)
}
 0x273   :  { %311 = dma.vmem_to_hbm [thread:$0]  %s309_s28, 128, %s615_s7, [#allocation13]  }
 0x274   :  { %s534_s9 = smov [#allocation11]  }
 0x275   :  { %s298_s10 = sshll.u32 %s534_s9, 4  ;;  %s299_s10 = int_to_ptr.vmem [resolvable:$true] %s298_s10 }
 0x276   :  { %s491_s11 = scalar_lea.vmem %s299_s10, 128  ;;  %p496_p3 = scmp.lt.s32.totalorder %s299_s10, %s299_s10 }
 0x277   :  { %p492_p2 = scmp.ne.s32.totalorder %s299_s10, %s491_s11  ;;  %p497_p4 = scmp.lt.s32.totalorder %s491_s11, %s491_s11 }
 0x279   :  { %p498_p5 = por %p497_p4, %p496_p3 }
 0x27b   :  { %p499_p6 = pnand %p498_p5, %p492_p2 }
 0x2e1   :  { %v284_v32 = vpop.permute.xlu0 %283 }
 0x2e2   :  { %286 = vst.msk [vmem:[#allocation11] sm:$0xff] %vm97_vm2, %v284_v32 }
 0x2e3   :  { %502 = shalt.err (!%p499_p6)
}
 0x2e4   :  { %301 = dma.vmem_to_hbm [thread:$0]  %s299_s10, 128, %s614_s6, [#allocation4]  }
 0x2e5   :  { %517 = dma.done.wait [#allocation4], 128  }
 0x2e6   :  { %518 = vsyncadd [#allocation4], 4294967168 }
 0x2e7   :  { %519 = dma.done.wait [#allocation13], 128  }
 0x2e8   :  { %520 = vsyncadd [#allocation13], 4294967168 }
 0x2e9   :  { %318 = vsyncpa [#allocation3], 1 }
 0x2ea   :  { %319 = vsyncpa [#allocation6], 1 }
 0x2eb   :  { %320 = vsyncpa [#allocation9], 1 }
 0x2ec   :  { %321 = vsyncpa [#allocation4], 1 }
 0x2ed   :  { %322 = vsyncpa [#allocation13], 1 }

</bundles_post_ra>
